<compile_context>
chip_gen: v7x
topology: tpu7x:2x2x1
jax: 0.10.0
libtpu: 0.0.40
codegen_flags: <defaults>
</compile_context>

<pallas_src>
import functools

import jax
import jax.numpy as jnp
from jax.experimental import pallas as pl
from jax.experimental.pallas import tpu as pltpu

INPUT_DIM = 8252
BOTTLENECK_DIM = 1
_DEFAULT_TB = 256  # batch rows per tile; multiple of 8; ~8.4 MiB of x per buffer


def _round_up(x, m):
    return ((x + m - 1) // m) * m


def _linear_n1_kernel(x_ref, w_ref, b_ref, o_ref):
    # x_ref: (TB, K) f32 VMEM    w_ref: (1, K) f32 VMEM (resident across grid)
    # b_ref: (1,)    f32 SMEM    o_ref: (TB, 1) f32 VMEM
    x = x_ref[...]
    w = w_ref[...]
    # VPU multiply (weight row sublane-broadcast over the batch dim) followed by
    # a single cross-lane (XLU) reduction -> (TB, 1). Mosaic masks the ragged
    # K=8252 tail lanes internally.
    acc = jnp.sum(x * w, axis=-1, keepdims=True)
    o_ref[...] = acc + b_ref[0]


@functools.partial(jax.jit, static_argnames=("tb",))
def linear_encoder_forward(x, weight, bias, *, tb=_DEFAULT_TB):
    """y = x @ weight.T + bias  (exact nn.Linear forward, bottleneck_dim == 1).

    x:      (B, K) float32
    weight: (1, K) float32   (PyTorch nn.Linear weight layout, used as-is)
    bias:   (1,)   float32
    returns (B, 1) float32
    """
    B, K = x.shape
    N = weight.shape[0]
    # Kernel is specialized for the module spec (bottleneck_dim == 1).
    assert N == 1, "kernel specialized for bottleneck_dim == 1"
    assert weight.shape == (N, K) and bias.shape == (N,)

    # Batch tile: multiple of 8 sublanes; don't over-allocate for tiny B.
    tb = max(8, min(tb, _round_up(B, 8)))
    grid = (pl.cdiv(B, tb),)

    out = pl.pallas_call(
        _linear_n1_kernel,
        out_shape=jax.ShapeDtypeStruct((B, N), jnp.float32),
        grid=grid,
        in_specs=[
            # x: streamed / double-buffered batch tiles.
            pl.BlockSpec((tb, K), lambda i: (i, 0)),
            # weight: constant block index -> stays resident in VMEM.
            pl.BlockSpec((N, K), lambda i: (0, 0)),
            # bias: scalar in SMEM, untiled.
            pl.BlockSpec(memory_space=pltpu.MemorySpace.SMEM),
        ],
        out_specs=pl.BlockSpec((tb, N), lambda i: (i, 0)),
        compiler_params=pltpu.CompilerParams(
            # Batch tiles are independent -> shard across TCs on v7x megacore.
            dimension_semantics=("parallel",),
            # TB=256 double-buffered (~17 MiB) + weight; headroom on all gens
            # (v5e default scoped limit is only 16 MiB, so raise it explicitly).
            vmem_limit_bytes=48 << 20,
        ),
        cost_estimate=pl.CostEstimate(
            flops=2 * B * K * N,
            transcendentals=0,
            bytes_accessed=4 * (B * K + N * K + N + B * N),
        ),
    )(x, weight, bias)

    # TODO(synk): if numerics allow, accept x/weight in bfloat16 (f32 accumulate)
    # to halve the HBM-bound input stream (~2x on v6e/v7x).
    return out


def init_linear_encoder_params(key, input_dim, bottleneck_dim):
    """Mirrors the PyTorch module init:
    weight ~ U(-0.005, 0.005) (explicit init.uniform_),
    bias   ~ U(-1/sqrt(in), 1/sqrt(in)) (nn.Linear default)."""
    kw, kb = jax.random.split(key)
    weight = jax.random.uniform(
        kw, (bottleneck_dim, input_dim), jnp.float32, -0.005, 0.005
    )
    bound = 1.0 / jnp.sqrt(jnp.float32(input_dim))
    bias = jax.random.uniform(kb, (bottleneck_dim,), jnp.float32, -bound, bound)
    return weight, bias


if __name__ == "__main__":
    key = jax.random.PRNGKey(0)
    k_params, k_x, k_x2 = jax.random.split(key, 3)

    weight, bias = init_linear_encoder_params(k_params, INPUT_DIM, BOTTLENECK_DIM)

    # Small-batch check (single partial tile).
    batch = 2
    x = jax.random.normal(k_x, (batch, INPUT_DIM), jnp.float32)
    y = jax.block_until_ready(linear_encoder_forward(x, weight, bias))
    y_ref = x @ weight.T + bias
    assert y.shape == (batch, BOTTLENECK_DIM)
    assert jnp.allclose(y, y_ref, atol=1e-4, rtol=1e-4)

    # Multi-tile check (grid > 1, ragged last tile).
    batch2 = 300
    x2 = jax.random.normal(k_x2, (batch2, INPUT_DIM), jnp.float32)
    y2 = jax.block_until_ready(linear_encoder_forward(x2, weight, bias))
    y2_ref = x2 @ weight.T + bias
    assert y2.shape == (batch2, BOTTLENECK_DIM)
    assert jnp.allclose(y2, y2_ref, atol=1e-4, rtol=1e-4)

    print("KERNEL_OK")
</pallas_src>

<mosaic_0001>
module attributes {stable_mosaic.version = 11 : i64} {
  func.func @_linear_n1_kernel(%arg0: i32, %arg1: memref<8x8252xf32, #tpu.memory_space<vmem>>, %arg2: memref<1x8252xf32, #tpu.memory_space<vmem>>, %arg3: memref<1xf32, #tpu.memory_space<smem>>, %arg4: memref<8x1xf32, #tpu.memory_space<vmem>>) attributes {dimension_semantics = [#tpu.dimension_semantics<parallel>], iteration_bounds = array<i64: 1>, scalar_prefetch = 0 : i64, scratch_operands = 0 : i64, tpu.core_type = #tpu.core_type<tc>, window_params = [{transform_indices = @transform_0, window_bounds = array<i64: 8, 8252>}, {pipeline_mode = #tpu.pipeline_mode<synchronous>, transform_indices = @transform_1, window_bounds = array<i64: 1, 8252>}, {transform_indices = @transform_2, window_bounds = array<i64: 1>}, {transform_indices = @transform_3, window_bounds = array<i64: 8, 1>}]} {
    %c0 = arith.constant 0 : index
    %c0_0 = arith.constant 0 : index
    %0 = vector.load %arg1[%c0, %c0_0] : memref<8x8252xf32, #tpu.memory_space<vmem>>, vector<8x8252xf32>
    %c0_1 = arith.constant 0 : index
    %c0_2 = arith.constant 0 : index
    %1 = vector.load %arg2[%c0_1, %c0_2] : memref<1x8252xf32, #tpu.memory_space<vmem>>, vector<1x8252xf32>
    %2 = vector.broadcast %1 : vector<1x8252xf32> to vector<8x8252xf32>
    %3 = arith.mulf %0, %2 : vector<8x8252xf32>
    %cst = arith.constant dense<0.000000e+00> : vector<8xf32>
    %4 = vector.multi_reduction <add>, %3, %cst [1] : vector<8x8252xf32> to vector<8xf32>
    %5 = vector.shape_cast %4 : vector<8xf32> to vector<8x1xf32>
    %c0_3 = arith.constant 0 : index
    %6 = memref.load %arg3[%c0_3] : memref<1xf32, #tpu.memory_space<smem>>
    %7 = vector.broadcast %6 : f32 to vector<8x1xf32>
    %8 = arith.addf %5, %7 : vector<8x1xf32>
    %c0_4 = arith.constant 0 : index
    %c0_5 = arith.constant 0 : index
    %9 = vector.load %arg4[%c0_4, %c0_5] : memref<8x1xf32, #tpu.memory_space<vmem>>, vector<8x1xf32>
    tpu.vector_store %arg4[%c0_4, %c0_5], %8 {strides = array<i32>} : memref<8x1xf32, #tpu.memory_space<vmem>>, vector<8x1xf32>,
    return
  }
  func.func @transform_0(%arg0: i32) -> (i32, i32) {
    %c0_i32 = arith.constant 0 : i32
    %c0_i32_0 = arith.constant 0 : i32
    return %arg0, %c0_i32 : i32, i32
  }
  func.func @transform_1(%arg0: i32) -> (i32, i32) {
    %c0_i32 = arith.constant 0 : i32
    %c0_i32_0 = arith.constant 0 : i32
    %c0_i32_1 = arith.constant 0 : i32
    return %c0_i32, %c0_i32_0 : i32, i32
  }
  func.func @transform_2(%arg0: i32) -> i32 {
    %c0_i32 = arith.constant 0 : i32
    %c0_i32_0 = arith.constant 0 : i32
    return %c0_i32 : i32
  }
  func.func @transform_3(%arg0: i32) -> (i32, i32) {
    %c0_i32 = arith.constant 0 : i32
    %c0_i32_0 = arith.constant 0 : i32
    return %arg0, %c0_i32 : i32, i32
  }
}

</mosaic_0001>

<bundles_post_ra>
// kernel: linear_encoder_forward.1
= control target key start
LH: loop header
LB: loop body
LE: loop exit
PB: predicated region body
PF: predicated region fallthrough
CT: control target
= control target key end

     0   :  { %9 = vsyncpa [#allocation4], 0  ;;  %s3046_s0 = inlined_call_operand.hbm [shape: f32[2,8252], index: 0, kind: input, shape index: {}]   ;;  %s3047_s1 = inlined_call_operand.hbm [shape: f32[1,8252], index: 1, kind: input, shape index: {}]   ;;  %s3048_s2 = inlined_call_operand.<no memory space> [shape: f32[1], index: 2, kind: input, shape index: {}]   ;;  %s3049_s3 = inlined_call_operand.vmem [shape: f32[2,1], index: 3, kind: output, shape index: {}]  }
   0x1   :  { %10 = vsyncpa [#allocation6], 0 }
   0x2   :  { %15 = vsyncadd [#allocation4], 6240  ;;  %s2010_s12 = smov [#allocation3]   ;;  %s1962_s16 = scalar_lea.hbm %s3046_s0, 2080 }
   0x3   :  { %s16_s13 = sshll.u32 %s2010_s12, 4  ;;  %p1963_p0 = scmp.ne.s32.totalorder %s3046_s0, %s1962_s16  ;;  %s17_s13 = int_to_ptr.vmem [resolvable:$true] %s16_s13 }
   0x4   :  { %p1966_p1 = scmp.lt.u32.totalorder %s1962_s16, %s3046_s0 }
   0x6   :  { %p1968_p2 = pnand %p1966_p1, %p1963_p0 }
   0x8   :  { %1971 = shalt.err (!%p1968_p2)
}
   0x9   :  { %s1972_s21 = scalar_lea.vmem %s17_s13, 2080  ;;  %s1976_s22 = scalar_lea.vmem %s17_s13, 8320 }
   0xa   :  { %p1973_p3 = scmp.ne.s32.totalorder %s17_s13, %s1972_s21  ;;  %p1977_p4 = scmp.lt.s32.totalorder %s17_s13, %s17_s13 }
   0xb   :  { %p1978_p5 = scmp.lt.s32.totalorder %s1976_s22, %s1972_s21 }
   0xd   :  { %p1979_p6 = por %p1978_p5, %p1977_p4 }
   0xf   :  { %p1980_p7 = pnand %p1979_p6, %p1973_p3 }
  0x11   :  { %1983 = shalt.err (!%p1980_p7)
}
  0x12   :  { %s2011_s23 = smov 2080   ;;  %s2012_s24 = smov 130  }
  0x13   :  { %22 = dma.hbm_to_vmem [thread:$0]  %s3046_s0, 2080, %s17_s13, [#allocation4], %s2011_s23, %s2011_s23, %s2012_s24  }
  0x14   :  { %s2013_s27 = smov [#allocation5]   ;;  %s1984_s4 = scalar_lea.hbm %s3047_s1, 1040 }
  0x15   :  { %s29_s28 = sshll.u32 %s2013_s27, 4  ;;  %p1985_p8 = scmp.ne.s32.totalorder %s3047_s1, %s1984_s4  ;;  %s30_s28 = int_to_ptr.vmem [resolvable:$true] %s29_s28 }
  0x16   :  { %p1988_p9 = scmp.lt.u32.totalorder %s1984_s4, %s3047_s1 }
  0x18   :  { %p1990_p10 = pnand %p1988_p9, %p1985_p8 }
  0x1a   :  { %1993 = shalt.err (!%p1990_p10)
}
  0x1b   :  { %s1994_s9 = scalar_lea.vmem %s30_s28, 1040  ;;  %s1998_s0 = scalar_lea.vmem %s30_s28, 1056 }
  0x1c   :  { %p1995_p11 = scmp.ne.s32.totalorder %s30_s28, %s1994_s9  ;;  %p1999_p12 = scmp.lt.s32.totalorder %s30_s28, %s30_s28 }
  0x1d   :  { %p2000_p13 = scmp.lt.s32.totalorder %s1998_s0, %s1994_s9 }
  0x1f   :  { %p2001_p0 = por %p2000_p13, %p1999_p12 }
  0x21   :  { %p2002_p1 = pnand %p2001_p0, %p1995_p11 }
  0x23   :  { %2005 = shalt.err (!%p2002_p1)
}
  0x24   :  { %32 = dma.hbm_to_vmem [thread:$0]  %s3047_s1, 1040, %s30_s28, [#allocation6]  }
  0x25   :  { %2006 = dma.done.wait [#allocation4], 8320  }
  0x26   :  { %2007 = vsyncadd [#allocation4], 4294958976 }
  0x27   :  { %2008 = dma.done.wait [#allocation6], 1040  }
  0x28   :  { %2009 = vsyncadd [#allocation6], 4294966256  ;;  %v127_v0 = vlaneseq  ;;  %v2014_v1 = vmov 1983009808   ;;  %v114_v6 = vld [vmem:[#allocation5 + $0x28] sm:$0xff]  ;;  %v2069_v11 = vld [vmem:[#allocation5 + $0x20] sm:$0xff] }
  0x29   :  { %v392_v2 = vunpack.c.l.s4 %v2014_v1  ;;  %v115_v16 = vld [vmem:[#allocation5 + $0x30] sm:$0xff]  ;;  %v116_v29 = vld [vmem:[#allocation5 + $0x38] sm:$0xff]  ;;  %vm1905_vm0 = vcmask 490496   ;;  %vm1913_vm1 = vcmask 7168  }
  0x2a   :  { %v128_v3 = vshrl.u32 %v127_v0, 7 }
  0x2b   :  { %v393_v4 = vunpack.c.0.s8 %v392_v2 }
  0x2c   :  { %v2059_v5 = vsub.s32 0, %v128_v3  ;;  %v2061_v7 = vsub.s32 4, %v128_v3  ;;  %v2063_v8 = vsub.s32 5, %v128_v3  ;;  %v2065_v9 = vsub.s32 6, %v128_v3 }
  0x2d   :  { %v2067_v10 = vsub.s32 7, %v128_v3  ;;  %v2071_v12 = vsub.s32 1, %v128_v3  ;;  %v2073_v13 = vsub.s32 2, %v128_v3  ;;  %v2075_v14 = vsub.s32 3, %v128_v3 }
  0x2e   :  { %v2077_v15 = vsub.s32 %v393_v4, %v128_v3  ;;  %v274_v17 = vrot.slane %v2069_v11, %v2061_v7  ;;  %v278_v18 = vrot.slane %v2069_v11, %v2063_v8  ;;  %v282_v19 = vrot.slane %v2069_v11, %v2065_v9 }
  0x2f   :  { %v286_v20 = vrot.slane %v2069_v11, %v2067_v10  ;;  %v290_v21 = vrot.slane %v114_v6, %v2059_v5  ;;  %v294_v22 = vrot.slane %v114_v6, %v2071_v12  ;;  %v298_v23 = vrot.slane %v114_v6, %v2073_v13 }
  0x30   :  { %3118 = vst [vmem:[#allocation10_spill] sm:$0xff] %v2077_v15  ;;  %v302_v24 = vrot.slane %v114_v6, %v2075_v14  ;;  %v306_v25 = vrot.slane %v114_v6, %v2061_v7  ;;  %v310_v26 = vrot.slane %v114_v6, %v2063_v8  ;;  %v314_v27 = vrot.slane %v114_v6, %v2065_v9 }
  0x31   :  { %v318_v28 = vrot.slane %v114_v6, %v2067_v10  ;;  %v322_v30 = vrot.slane %v115_v16, %v2059_v5  ;;  %v326_v31 = vrot.slane %v115_v16, %v2071_v12  ;;  %v330_v32 = vrot.slane %v115_v16, %v2073_v13 }
  0x32   :  { %v334_v33 = vrot.slane %v115_v16, %v2075_v14  ;;  %v338_v34 = vrot.slane %v115_v16, %v2061_v7  ;;  %v342_v35 = vrot.slane %v115_v16, %v2063_v8  ;;  %v346_v36 = vrot.slane %v115_v16, %v2065_v9 }
  0x33   :  { %v350_v37 = vrot.slane %v115_v16, %v2067_v10  ;;  %v711_v38 = vcombine.low %v274_v17, %v278_v18  ;;  %v712_v39 = vcombine.high %v274_v17, %v278_v18  ;;  %v713_v40 = vcombine.low %v282_v19, %v286_v20 }
  0x34   :  { %v714_v41 = vcombine.high %v282_v19, %v286_v20  ;;  %v2104_v42 = vrot.slane %v116_v29, %v2059_v5  ;;  %v2107_v43 = vrot.slane %v116_v29, %v2071_v12  ;;  %v2110_v44 = vrot.slane %v116_v29, %v2073_v13 }
  0x35   :  { %v2113_v45 = vrot.slane %v116_v29, %v2075_v14  ;;  %v2116_v46 = vrot.slane %v711_v38, %v2077_v15  ;;  %v2119_v47 = vrot.slane %v712_v39, %v2077_v15  ;;  %v2122_v48 = vrot.slane %v713_v40, %v2077_v15 }
  0x36   :  { %v2125_v49 = vrot.slane %v714_v41, %v2077_v15  ;;  %v2128_v50 = vrot.slane %v116_v29, %v2061_v7  ;;  %v2131_v51 = vrot.slane %v116_v29, %v2063_v8  ;;  %v2134_v52 = vrot.slane %v116_v29, %v2065_v9 }
  0x37   :  { %v2137_v53 = vrot.slane %v116_v29, %v2067_v10  ;;  %v747_v58 = vcombine.low %v290_v21, %v294_v22  ;;  %v748_v59 = vcombine.high %v290_v21, %v294_v22  ;;  %v749_v60 = vcombine.low %v298_v23, %v302_v24 }
  0x38   :  { %v750_v61 = vcombine.high %v298_v23, %v302_v24  ;;  %v783_v62 = vcombine.low %v306_v25, %v310_v26  ;;  %v784_v63 = vcombine.high %v306_v25, %v310_v26  ;;  %v785_v0 = vcombine.low %v314_v27, %v318_v28  ;;  %v110_v23 = vld [vmem:[#allocation5 + $0x8] sm:$0xff] }
  0x39   :  { %v786_v1 = vcombine.high %v314_v27, %v318_v28  ;;  %v2148_v2 = vrot.slane %v747_v58, %v2077_v15  ;;  %v2151_v3 = vrot.slane %v748_v59, %v2077_v15  ;;  %v2154_v4 = vrot.slane %v749_v60, %v2077_v15  ;;  %v109_v27 = vld [vmem:[#allocation5] sm:$0xff] }
  0x3a   :  { %v2157_v6 = vrot.slane %v750_v61, %v2077_v15  ;;  %v2160_v16 = vrot.slane %v783_v62, %v2077_v15  ;;  %v2163_v17 = vrot.slane %v784_v63, %v2077_v15  ;;  %v2166_v18 = vrot.slane %v785_v0, %v2077_v15 }
  0x3b   :  { %v2169_v19 = vrot.slane %v786_v1, %v2077_v15  ;;  %v819_v28 = vcombine.low %v322_v30, %v326_v31  ;;  %v820_v29 = vcombine.high %v322_v30, %v326_v31  ;;  %v821_v38 = vcombine.low %v330_v32, %v334_v33 }
  0x3c   :  { %v822_v39 = vcombine.high %v330_v32, %v334_v33  ;;  %v855_v40 = vcombine.low %v338_v34, %v342_v35  ;;  %v856_v41 = vcombine.high %v338_v34, %v342_v35  ;;  %v857_v58 = vcombine.low %v346_v36, %v350_v37 }
  0x3d   :  { %3119 = vst [vmem:[#allocation11_spill] sm:$0xff] %v2169_v19  ;;  %v858_v59 = vcombine.high %v346_v36, %v350_v37  ;;  %v2188_v60 = vrot.slane %v819_v28, %v2077_v15  ;;  %v2191_v61 = vrot.slane %v820_v29, %v2077_v15  ;;  %v2194_v62 = vrot.slane %v821_v38, %v2077_v15 }
  0x3e   :  { %v2197_v63 = vrot.slane %v822_v39, %v2077_v15  ;;  %v2200_v30 = vrot.slane %v855_v40, %v2077_v15  ;;  %v2203_v31 = vrot.slane %v856_v41, %v2077_v15  ;;  %v2206_v32 = vrot.slane %v857_v58, %v2077_v15 }
  0x3f   :  { %3120 = vst [vmem:[#allocation12_spill] sm:$0xff] %v2191_v61  ;;  %v2209_v33 = vrot.slane %v858_v59, %v2077_v15  ;;  %v891_v38 = vcombine.low %v2104_v42, %v2107_v43  ;;  %v892_v39 = vcombine.high %v2104_v42, %v2107_v43  ;;  %v893_v40 = vcombine.low %v2110_v44, %v2113_v45 }
  0x40   :  { %3121 = vst [vmem:[#allocation13_spill] sm:$0xff] %v2197_v63  ;;  %3122 = vst [vmem:[#allocation14_spill] sm:$0xff] %v2203_v31  ;;  %v894_v41 = vcombine.high %v2110_v44, %v2113_v45  ;;  %v927_v58 = vcombine.low %v2128_v50, %v2131_v51  ;;  %v928_v59 = vcombine.high %v2128_v50, %v2131_v51 }
  0x41   :  { %3123 = vst [vmem:[#allocation15_spill] sm:$0xff] %v2209_v33  ;;  %v929_v29 = vcombine.low %v2134_v52, %v2137_v53  ;;  %v930_v37 = vcombine.high %v2134_v52, %v2137_v53  ;;  %v2244_v42 = vrot.slane %v891_v38, %v2077_v15  ;;  %v2247_v43 = vrot.slane %v892_v39, %v2077_v15 }
  0x42   :  { %v2250_v44 = vrot.slane %v893_v40, %v2077_v15  ;;  %v2253_v45 = vrot.slane %v894_v41, %v2077_v15  ;;  %v2256_v50 = vrot.slane %v927_v58, %v2077_v15  ;;  %v2259_v51 = vrot.slane %v928_v59, %v2077_v15  ;;  %v111_v40 = vld [vmem:[#allocation5 + $0x10] sm:$0xff] }
  0x43   :  { %3124 = vst [vmem:[#allocation16_spill] sm:$0xff] %v2247_v43  ;;  %v2262_v52 = vrot.slane %v929_v29, %v2077_v15  ;;  %v2265_v53 = vrot.slane %v930_v37, %v2077_v15  ;;  %v130_v57 = vrot.slane %v109_v27, %v2059_v5  ;;  %v134_v28 = vrot.slane %v109_v27, %v2071_v12  ;;  %v112_v29 = vld [vmem:[#allocation5 + $0x18] sm:$0xff] }
  0x44   :  { %3125 = vst [vmem:[#allocation17_spill] sm:$0xff] %v2253_v45  ;;  %3126 = vst [vmem:[#allocation18_spill] sm:$0xff] %v2259_v51  ;;  %v138_v41 = vrot.slane %v109_v27, %v2073_v13  ;;  %v142_v36 = vrot.slane %v109_v27, %v2075_v14  ;;  %v146_v26 = vrot.slane %v109_v27, %v2061_v7 }
  0x45   :  { %3127 = vst [vmem:[#allocation19_spill] sm:$0xff] %v2265_v53  ;;  %v150_v22 = vrot.slane %v109_v27, %v2063_v8  ;;  %v154_v37 = vrot.slane %v109_v27, %v2065_v9  ;;  %v158_v56 = vrot.slane %v109_v27, %v2067_v10  ;;  %v162_v59 = vrot.slane %v110_v23, %v2059_v5 }
  0x46   :  { %v166_v39 = vrot.slane %v110_v23, %v2071_v12  ;;  %v170_v1 = vrot.slane %v110_v23, %v2073_v13  ;;  %v174_v35 = vrot.slane %v110_v23, %v2075_v14  ;;  %v2296_v25 = vrot.slane %v110_v23, %v2061_v7 }
  0x47   :  { %v2299_v21 = vrot.slane %v110_v23, %v2063_v8  ;;  %v2302_v55 = vrot.slane %v110_v23, %v2065_v9  ;;  %v2305_v27 = vrot.slane %v110_v23, %v2067_v10  ;;  %v2308_v58 = vrot.slane %v111_v40, %v2059_v5 }
  0x48   :  { %v2311_v38 = vrot.slane %v111_v40, %v2071_v12  ;;  %v2314_v0 = vrot.slane %v111_v40, %v2073_v13  ;;  %v2317_v34 = vrot.slane %v111_v40, %v2075_v14  ;;  %v2320_v24 = vrot.slane %v111_v40, %v2061_v7 }
  0x49   :  { %3128 = vst [vmem:[#allocation20_spill] sm:$0xff] %v2308_v58  ;;  %v2323_v20 = vrot.slane %v111_v40, %v2063_v8  ;;  %v2326_v23 = vrot.slane %v111_v40, %v2065_v9  ;;  %v2329_v54 = vrot.slane %v111_v40, %v2067_v10  ;;  %v2332_v53 = vrot.slane %v112_v29, %v2059_v5 }
  0x4a   :  { %3129 = vst [vmem:[#allocation21_spill] sm:$0xff] %v2311_v38  ;;  %3130 = vst [vmem:[#allocation22_spill] sm:$0xff] %v2314_v0  ;;  %v2335_v51 = vrot.slane %v112_v29, %v2071_v12  ;;  %v2338_v45 = vrot.slane %v112_v29, %v2073_v13  ;;  %v2350_v40 = vrot.slane %v112_v29, %v2065_v9  ;;  %v84_v0 = vld [vmem:[#allocation3 + $0x14c] sm:$0xff]  ;;  %v85_v38 = vld [vmem:[#allocation3 + $0x154] sm:$0xff] }
  0x4b   :  { %3131 = vst [vmem:[#allocation23_spill] sm:$0xff] %v2317_v34  ;;  %3132 = vst [vmem:[#allocation24_spill] sm:$0xff] %v2320_v24  ;;  %v2341_v24 = vrot.slane %v112_v29, %v2075_v14  ;;  %v388_v43 = vcombine.high %v130_v57, %v134_v28  ;;  %v390_v33 = vcombine.high %v138_v41, %v142_v36 }
  0x4c   :  { %3133 = vst [vmem:[#allocation25_spill] sm:$0xff] %v2323_v20  ;;  %3134 = vst [vmem:[#allocation26_spill] sm:$0xff] %v2326_v23  ;;  %v2344_v20 = vrot.slane %v112_v29, %v2061_v7  ;;  %v2347_v23 = vrot.slane %v112_v29, %v2063_v8  ;;  %v425_v31 = vcombine.low %v154_v37, %v158_v56 }
  0x4d   :  { %3135 = vst [vmem:[#allocation27_spill] sm:$0xff] %v2329_v54  ;;  %3136 = vst [vmem:[#allocation28_spill] sm:$0xff] %v2332_v53  ;;  %v387_v54 = vcombine.low %v130_v57, %v134_v28  ;;  %v389_v53 = vcombine.low %v138_v41, %v142_v36  ;;  %v424_v63 = vcombine.high %v146_v26, %v150_v22 }
  0x4e   :  { %3137 = vst [vmem:[#allocation29_spill] sm:$0xff] %v2335_v51  ;;  %3138 = vst [vmem:[#allocation30_spill] sm:$0xff] %v2338_v45  ;;  %v423_v51 = vcombine.low %v146_v26, %v150_v22  ;;  %v426_v45 = vcombine.high %v154_v37, %v158_v56  ;;  %v459_v61 = vcombine.low %v162_v59, %v166_v39  ;;  %v53_v37 = vld [vmem:[#allocation3 + $0x60] sm:$0xff] }
  0x4f   :  { %3139 = vst [vmem:[#allocation31_spill] sm:$0xff] %v2341_v24  ;;  %3140 = vst [vmem:[#allocation32_spill] sm:$0xff] %v2344_v20  ;;  %v461_v19 = vcombine.low %v170_v1, %v174_v35  ;;  %v2353_v24 = vrot.slane %v112_v29, %v2067_v10  ;;  %v2357_v7 = vrot.slane %v2069_v11, %v2059_v5  ;;  %v52_v29 = vld [vmem:[#allocation3 + $0x58] sm:$0xff]  ;;  %v70_v20 = vld [vmem:[#allocation3 + $0xe2] sm:$0xff] }
  0x50   :  { %3141 = vst [vmem:[#allocation33_spill] sm:$0xff] %v2347_v23  ;;  %3142 = vst [vmem:[#allocation34_spill] sm:$0xff] %v2350_v40  ;;  %v2361_v8 = vrot.slane %v2069_v11, %v2071_v12  ;;  %v2365_v9 = vrot.slane %v2069_v11, %v2073_v13  ;;  %v2368_v57 = vrot.slane %v387_v54, %v2077_v15 }
  0x51   :  { %3143 = vst [vmem:[#allocation35_spill] sm:$0xff] %v2353_v24  ;;  %3144 = vst [vmem:[#allocation36_spill] sm:$0xff] %v2357_v7  ;;  %v2371_v56 = vrot.slane %v389_v53, %v2077_v15  ;;  %v460_v10 = vcombine.high %v162_v59, %v166_v39  ;;  %v462_v22 = vcombine.high %v170_v1, %v174_v35  ;;  %v50_v53 = vld [vmem:[#allocation3 + $0x48] sm:$0xff]  ;;  %v51_v39 = vld [vmem:[#allocation3 + $0x50] sm:$0xff] }
  0x52   :  { %3145 = vst [vmem:[#allocation37_spill] sm:$0xff] %v2361_v8  ;;  %3146 = vst [vmem:[#allocation38_spill] sm:$0xff] %v2365_v9  ;;  %v2374_v26 = vrot.slane %v388_v43, %v2077_v15  ;;  %v2377_v5 = vrot.slane %v390_v33, %v2077_v15  ;;  %v2380_v12 = vrot.slane %v423_v51, %v2077_v15  ;;  %v41_v43 = vld [vmem:[#allocation3] sm:$0xff]  ;;  %v54_v59 = vld [vmem:[#allocation3 + $0x68] sm:$0xff] }
  0x53   :  { %v2383_v13 = vrot.slane %v425_v31, %v2077_v15  ;;  %v2386_v54 = vrot.slane %v424_v63, %v2077_v15  ;;  %v2389_v36 = vrot.slane %v426_v45, %v2077_v15  ;;  %v2392_v35 = vrot.slane %v459_v61, %v2077_v15  ;;  %v67_v7 = vld [vmem:[#allocation3 + $0xca] sm:$0xff]  ;;  %v69_v24 = vld [vmem:[#allocation3 + $0xda] sm:$0xff] }
  0x54   :  { %v2395_v1 = vrot.slane %v461_v19, %v2077_v15  ;;  %v495_v33 = vcombine.low %v2296_v25, %v2299_v21  ;;  %v496_v28 = vcombine.high %v2296_v25, %v2299_v21  ;;  %v497_v31 = vcombine.low %v2302_v55, %v2305_v27  ;;  %v42_v21 = vld [vmem:[#allocation3 + $0x8] sm:$0xff]  ;;  %v43_v25 = vld [vmem:[#allocation3 + $0x10] sm:$0xff] }
  0x55   :  { %v498_v63 = vcombine.high %v2302_v55, %v2305_v27  ;;  %v2407_v61 = vrot.slane %v2069_v11, %v2075_v14  ;;  %v419_v19 = vcombine.low %v2368_v57, %v2371_v56  ;;  %v2412_v45 = vrot.slane %v460_v10, %v2077_v15  ;;  %v59_v10 = vld [vmem:[#allocation3 + $0x8a] sm:$0xff] }
  0x56   :  { %v2415_v51 = vrot.slane %v462_v22, %v2077_v15  ;;  %v420_v55 = vcombine.high %v2368_v57, %v2371_v56  ;;  %v421_v11 = vcombine.low %v2374_v26, %v2377_v5  ;;  %v422_v14 = vcombine.high %v2374_v26, %v2377_v5  ;;  %v55_v22 = vld [vmem:[#allocation3 + $0x70] sm:$0xff]  ;;  %v56_v26 = vld [vmem:[#allocation3 + $0x78] sm:$0xff]  ;;  %v58_v5 = vld [vmem:[#allocation3 + $0x82] sm:$0xff] }
  0x57   :  { %3147 = vst [vmem:[#allocation39_spill] sm:$0xff] %v2407_v61  ;;  %v455_v41 = vcombine.low %v2380_v12, %v2383_v13  ;;  %v456_v27 = vcombine.high %v2380_v12, %v2383_v13  ;;  %v491_v56 = vcombine.low %v2392_v35, %v2395_v1  ;;  %v2434_v9 = vrot.slane %v495_v33, %v2077_v15  ;;  %v60_v57 = vld [vmem:[#allocation3 + $0x92] sm:$0xff]  ;;  %v92_v33 = vld [vmem:[#allocation3 + $0x186] sm:$0xff] }
  0x58   :  { %v2437_v61 = vrot.slane %v496_v28, %v2077_v15  ;;  %v2440_v12 = vrot.slane %v497_v31, %v2077_v15  ;;  %v2443_v13 = vrot.slane %v498_v63, %v2077_v15  ;;  %v492_v8 = vcombine.high %v2392_v35, %v2395_v1  ;;  %v68_v31 = vld [vmem:[#allocation3 + $0xd2] sm:$0xff] }
  0x59   :  { %3148 = vst [vmem:[#allocation40_spill] sm:$0xff] %v2434_v9  ;;  %v493_v40 = vcombine.low %v2412_v45, %v2415_v51  ;;  %v2459_v1 = vmul.f32 %v419_v19, %v41_v43  ;;  %v2461_v9 = vmul.f32 %v455_v41, %v42_v21  ;;  %v2463_v28 = vmul.f32 %v491_v56, %v43_v25  ;;  %v72_v35 = vld [vmem:[#allocation3 + $0xf2] sm:$0xff]  ;;  %v73_v43 = vld [vmem:[#allocation3 + $0xfa] sm:$0xff] }
  0x5a   :  { %3149 = vst [vmem:[#allocation41_spill] sm:$0xff] %v2437_v61  ;;  %3150 = vst [vmem:[#allocation42_spill] sm:$0xff] %v2440_v12  ;;  %v71_v61 = vld [vmem:[#allocation3 + $0xea] sm:$0xff]  ;;  %v3153_v12 = vcombine.low %v2116_v46, %v2122_v48  ;;  %v3154_v23 = vcombine.low %v2148_v2, %v2154_v4  ;;  %v3155_v34 = vcombine.low %v2160_v16, %v2166_v18 }
  0x5b   :  { %3151 = vst [vmem:[#allocation43_spill] sm:$0xff] %v2443_v13  ;;  %v75_v13 = vld [vmem:[#allocation3 + $0x104] sm:$0xff]  ;;  %3152 = vst [vmem:[#allocation44_spill] sm:$0xff] %v2463_v28  ;;  %v76_v19 = vld [vmem:[#allocation3 + $0x10c] sm:$0xff]  ;;  %v3156_v25 = vcombine.low %v2188_v60, %v2194_v62  ;;  %v2502_v58 = vmul.f32 %v492_v8, %v60_v57  ;;  %v3165_v8 = vcombine.high %v2160_v16, %v2166_v18 }
  0x5c   :  { %v2468_v15 = vmul.f32 %v3153_v12, %v50_v53  ;;  %v2473_v63 = vmul.f32 %v3154_v23, %v51_v39  ;;  %v2478_v21 = vmul.f32 %v3155_v34, %v52_v29  ;;  %v3158_v53 = vcombine.low %v2200_v30, %v2206_v32  ;;  %v77_v12 = vld [vmem:[#allocation3 + $0x114] sm:$0xff]  ;;  %v88_v28 = vld [vmem:[#allocation3 + $0x16c] sm:$0xff] }
  0x5d   :  { %v2483_v41 = vmul.f32 %v3156_v25, %v53_v37  ;;  %v3160_v23 = vcombine.low %v2244_v42, %v2250_v44  ;;  %v3162_v34 = vcombine.low %v2256_v50, %v2262_v52  ;;  %v1065_v37 = vmul.f32 %v420_v55, %v58_v5  ;;  %v90_v55 = vld [vmem:[#allocation3 + $0x17c] sm:$0xff] }
  0x5e   :  { %v2488_v56 = vmul.f32 %v3158_v53, %v54_v59  ;;  %v2500_v25 = vmul.f32 %v456_v27, %v59_v10  ;;  %v86_v59 = vld [vmem:[#allocation3 + $0x15c] sm:$0xff]  ;;  %v87_v53 = vld [vmem:[#allocation3 + $0x164] sm:$0xff]  ;;  %v93_v27 = vld [vmem:[#allocation3 + $0x18e] sm:$0xff]  ;;  %v2515_v10 = vmul.f32 %v3165_v8, %v69_v24  ;;  %v3166_v57 = vcombine.high %v2188_v60, %v2194_v62 }
  0x5f   :  { %3157 = vst [vmem:[#allocation45_spill] sm:$0xff] %v2483_v41  ;;  %v2493_v39 = vmul.f32 %v3160_v23, %v55_v22  ;;  %v2498_v29 = vmul.f32 %v3162_v34, %v56_v26  ;;  %v3163_v22 = vcombine.high %v2116_v46, %v2122_v48  ;;  %v1082_v41 = vmul.f32 %v421_v11, %v75_v13  ;;  %v89_v34 = vld [vmem:[#allocation3 + $0x174] sm:$0xff]  ;;  %v107_v8 = vld [vmem:[#allocation3 + $0x1fe] sm:$0xff] }
  0x60   :  { %3159 = vst [vmem:[#allocation46_spill] sm:$0xff] %v2488_v56  ;;  %v1099_v26 = vmul.f32 %v422_v14, %v92_v33  ;;  %v2520_v46 = vmul.f32 %v3166_v57, %v70_v20  ;;  %v3167_v48 = vcombine.high %v2200_v30, %v2206_v32  ;;  %v94_v11 = vld [vmem:[#allocation3 + $0x196] sm:$0xff]  ;;  %v101_v14 = vld [vmem:[#allocation3 + $0x1ce] sm:$0xff]  ;;  %v3169_v18 = vcombine.high %v2256_v50, %v2262_v52  ;;  %v3175_v33 = vld [vmem:[#allocation12_spill] sm:$0xff] }
  0x61   :  { %3161 = vst [vmem:[#allocation47_spill] sm:$0xff] %v2493_v39  ;;  %v1074_v23 = vmul.f32 %v3163_v22, %v67_v7  ;;  %v3164_v39 = vcombine.high %v2148_v2, %v2154_v4  ;;  %v3168_v4 = vcombine.high %v2244_v42, %v2250_v44  ;;  %v102_v16 = vld [vmem:[#allocation3 + $0x1d6] sm:$0xff]  ;;  %v3170_v20 = vcombine.low %v2386_v54, %v2389_v36  ;;  %v103_v42 = vld [vmem:[#allocation3 + $0x1de] sm:$0xff]  ;;  %v104_v44 = vld [vmem:[#allocation3 + $0x1e6] sm:$0xff] }
  0x62   :  { %v2525_v2 = vmul.f32 %v3167_v48, %v71_v61  ;;  %v2535_v24 = vmul.f32 %v3169_v18, %v73_v43  ;;  %v2542_v62 = vmul.f32 %v493_v40, %v77_v12  ;;  %v3171_v30 = vcombine.low %v2119_v47, %v2125_v49  ;;  %v3173_v50 = vld [vmem:[#allocation11_spill] sm:$0xff]  ;;  %v3178_v40 = vld [vmem:[#allocation14_spill] sm:$0xff]  ;;  %v3181_v57 = vld [vmem:[#allocation16_spill] sm:$0xff] }
  0x63   :  { %v2510_v56 = vmul.f32 %v3164_v39, %v68_v31  ;;  %v2530_v7 = vmul.f32 %v3168_v4, %v72_v35  ;;  %v2540_v60 = vmul.f32 %v3170_v20, %v76_v19  ;;  %v3172_v61 = vcombine.low %v2151_v3, %v2157_v6  ;;  %v3176_v31 = vld [vmem:[#allocation13_spill] sm:$0xff]  ;;  %v3179_v19 = vld [vmem:[#allocation15_spill] sm:$0xff] }
  0x64   :  { %v1091_v32 = vmul.f32 %v3171_v30, %v84_v0  ;;  %v3174_v52 = vcombine.low %v2163_v17, %v3173_v50  ;;  %v3177_v35 = vcombine.low %v3175_v33, %v3176_v31  ;;  %v3180_v39 = vcombine.low %v3178_v40, %v3179_v19  ;;  %v105_v0 = vld [vmem:[#allocation3 + $0x1ee] sm:$0xff]  ;;  %v106_v22 = vld [vmem:[#allocation3 + $0x1f6] sm:$0xff] }
  0x65   :  { %v1092_v5 = vmul.f32 %v3172_v61, %v85_v38  ;;  %v3182_v48 = vld [vmem:[#allocation17_spill] sm:$0xff]  ;;  %v1186_v20 = vcombine.low %v1082_v41, %v1099_v26  ;;  %v3185_v30 = vld [vmem:[#allocation18_spill] sm:$0xff]  ;;  %v3186_v61 = vld [vmem:[#allocation19_spill] sm:$0xff] }
  0x66   :  { %v1093_v13 = vmul.f32 %v3174_v52, %v86_v59  ;;  %v2556_v43 = vmul.f32 %v3177_v35, %v87_v53  ;;  %v2561_v12 = vmul.f32 %v3180_v39, %v88_v28  ;;  %v3183_v38 = vcombine.low %v3181_v57, %v3182_v48 }
  0x67   :  { %v3184_v59 = vcombine.high %v2386_v54, %v2389_v36  ;;  %v1184_v53 = vcombine.low %v2459_v1, %v1065_v37  ;;  %v3187_v28 = vcombine.low %v3185_v30, %v3186_v61  ;;  %v3188_v35 = vcombine.high %v2412_v45, %v2415_v51 }
  0x68   :  { %v2566_v4 = vmul.f32 %v3183_v38, %v89_v34  ;;  %v3189_v34 = vcombine.high %v2119_v47, %v2125_v49  ;;  %v3190_v54 = vcombine.high %v2151_v3, %v2157_v6  ;;  %v1185_v45 = vcombine.high %v2459_v1, %v1065_v37  ;;  %v3196_v1 = vld [vmem:[#allocation10_spill] sm:$0xff] }
  0x69   :  { %v2571_v18 = vmul.f32 %v3184_v59, %v93_v27  ;;  %v2577_v52 = vmul.f32 %v3187_v28, %v90_v55  ;;  %v2582_v39 = vmul.f32 %v3188_v35, %v94_v11  ;;  %v3191_v27 = vcombine.high %v2163_v17, %v3173_v50 }
  0x6a   :  { %v1108_v38 = vmul.f32 %v3189_v34, %v101_v14  ;;  %v1109_v36 = vmul.f32 %v3190_v54, %v102_v16  ;;  %v3192_v55 = vcombine.high %v3175_v33, %v3176_v31  ;;  %v1187_v51 = vcombine.high %v1082_v41, %v1099_v26 }
  0x6b   :  { %v1110_v59 = vmul.f32 %v3191_v27, %v103_v42  ;;  %v3193_v47 = vcombine.high %v3178_v40, %v3179_v19  ;;  %v3194_v3 = vcombine.high %v3181_v57, %v3182_v48  ;;  %v3195_v17 = vcombine.high %v3185_v30, %v3186_v61 }
  0x6c   :  { %v2596_v28 = vmul.f32 %v3192_v55, %v104_v44  ;;  %v1220_v14 = vcombine.low %v2461_v9, %v2500_v25  ;;  %v2617_v41 = vrot.slane %v1184_v53, %v3196_v1  ;;  %v2620_v37 = vrot.slane %v1186_v20, %v3196_v1 }
  0x6d   :  { %v2602_v49 = vmul.f32 %v3193_v47, %v105_v0  ;;  %v2607_v6 = vmul.f32 %v3194_v3, %v106_v22  ;;  %v2612_v11 = vmul.f32 %v3195_v17, %v107_v8  ;;  %v1221_v26 = vcombine.high %v2461_v9, %v2500_v25  ;;  %v3197_v47 = vld [vmem:[#allocation45_spill] sm:$0xff] }
  0x6e   :  { %v1222_v16 = vcombine.low %v2540_v60, %v2571_v18  ;;  %v1508_v42 = vcombine.low %v2468_v15, %v1074_v23  ;;  %v1509_v44 = vcombine.high %v2468_v15, %v1074_v23  ;;  %v1510_v50 = vcombine.low %v1091_v32, %v1108_v38  ;;  %v3214_v9 = vld [vmem:[#allocation21_spill] sm:$0xff] }
  0x6f   :  { %v1511_v33 = vcombine.high %v1091_v32, %v1108_v38  ;;  %v2629_v31 = vrot.slane %v1185_v45, %v3196_v1  ;;  %v2632_v40 = vrot.slane %v1187_v51, %v3196_v1  ;;  %v1223_v19 = vcombine.high %v2540_v60, %v2571_v18 }
  0x70   :  { %v1544_v0 = vcombine.low %v2473_v63, %v2510_v56  ;;  %v2639_v22 = vrot.slane %v1508_v42, %v3196_v1  ;;  %v2642_v8 = vrot.slane %v1509_v44, %v3196_v1  ;;  %v2645_v15 = vrot.slane %v1510_v50, %v3196_v1 }
  0x71   :  { %v2648_v23 = vrot.slane %v1511_v33, %v3196_v1  ;;  %v1216_v32 = vcombine.low %v2617_v41, %v2620_v37  ;;  %v2653_v57 = vrot.slane %v1220_v14, %v3196_v1  ;;  %v1545_v48 = vcombine.high %v2473_v63, %v2510_v56  ;;  %v3208_v33 = vld [vmem:[#allocation42_spill] sm:$0xff] }
  0x72   :  { %v1546_v53 = vcombine.low %v1092_v5, %v1109_v36  ;;  %v1547_v34 = vcombine.high %v1092_v5, %v1109_v36  ;;  %v2666_v38 = vrot.slane %v1544_v0, %v3196_v1  ;;  %v1580_v56 = vcombine.low %v2478_v21, %v2515_v10  ;;  %v3218_v5 = vld [vmem:[#allocation23_spill] sm:$0xff] }
  0x73   :  { %v2669_v54 = vrot.slane %v1545_v48, %v3196_v1  ;;  %v1581_v27 = vcombine.high %v2478_v21, %v2515_v10  ;;  %v1582_v55 = vcombine.low %v1093_v13, %v1110_v59  ;;  %v1583_v45 = vcombine.high %v1093_v13, %v1110_v59  ;;  %v61_v59 = vld [vmem:[#allocation3 + $0x9a] sm:$0xff] }
  0x74   :  { %v2672_v63 = vrot.slane %v1546_v53, %v3196_v1  ;;  %v2679_v51 = vrot.slane %v1547_v34, %v3196_v1  ;;  %v1616_v3 = vcombine.low %v3197_v47, %v2520_v46  ;;  %v2688_v17 = vrot.slane %v1580_v56, %v3196_v1  ;;  %v3210_v13 = vld [vmem:[#allocation43_spill] sm:$0xff] }
  0x75   :  { %v2691_v14 = vrot.slane %v1581_v27, %v3196_v1  ;;  %v2694_v21 = vrot.slane %v1582_v55, %v3196_v1  ;;  %v2697_v10 = vrot.slane %v1583_v45, %v3196_v1  ;;  %v1617_v42 = vcombine.high %v3197_v47, %v2520_v46  ;;  %v3198_v27 = vld [vmem:[#allocation46_spill] sm:$0xff] }
  0x76   :  { %v1618_v44 = vcombine.low %v2556_v43, %v2596_v28  ;;  %v1619_v53 = vcombine.high %v2556_v43, %v2596_v28  ;;  %v2718_v46 = vrot.slane %v1616_v3, %v3196_v1  ;;  %v1652_v55 = vcombine.low %v3198_v27, %v2525_v2 }
  0x77   :  { %v2721_v34 = vrot.slane %v1617_v42, %v3196_v1  ;;  %v1653_v45 = vcombine.high %v3198_v27, %v2525_v2  ;;  %v1654_v47 = vcombine.low %v2561_v12, %v2602_v49  ;;  %v1655_v43 = vcombine.high %v2561_v12, %v2602_v49 }
  0x78   :  { %v2724_v56 = vrot.slane %v1618_v44, %v3196_v1  ;;  %v2735_v28 = vrot.slane %v1619_v53, %v3196_v1  ;;  %v3199_v44 = vld [vmem:[#allocation47_spill] sm:$0xff]  ;;  %v2744_v2 = vrot.slane %v1652_v55, %v3196_v1  ;;  %v1690_v55 = vcombine.low %v2566_v4, %v2607_v6 }
  0x79   :  { %v1688_v48 = vcombine.low %v3199_v44, %v2530_v7  ;;  %v2747_v27 = vrot.slane %v1653_v45, %v3196_v1  ;;  %v2750_v12 = vrot.slane %v1654_v47, %v3196_v1  ;;  %v2753_v49 = vrot.slane %v1655_v43, %v3196_v1 }
  0x7a   :  { %v1689_v3 = vcombine.high %v3199_v44, %v2530_v7  ;;  %v1691_v42 = vcombine.high %v2566_v4, %v2607_v6  ;;  %v2780_v45 = vrot.slane %v1690_v55, %v3196_v1  ;;  %v1724_v47 = vcombine.low %v2498_v29, %v2535_v24 }
  0x7b   :  { %v2774_v7 = vrot.slane %v1688_v48, %v3196_v1  ;;  %v1725_v43 = vcombine.high %v2498_v29, %v2535_v24  ;;  %v1726_v53 = vcombine.low %v2577_v52, %v2612_v11  ;;  %v1727_v4 = vcombine.high %v2577_v52, %v2612_v11 }
  0x7c   :  { %v2777_v44 = vrot.slane %v1689_v3, %v3196_v1  ;;  %3202 = vst [vmem:[#allocation13_spill] sm:$0xff] %v2780_v45  ;;  %v1217_v6 = vcombine.high %v2617_v41, %v2620_v37  ;;  %v2793_v48 = vrot.slane %v1691_v42, %v3196_v1  ;;  %v2800_v29 = vrot.slane %v1724_v47, %v3196_v1  ;;  %v3211_v3 = vld [vmem:[#allocation41_spill] sm:$0xff]  ;;  %v78_v41 = vld [vmem:[#allocation3 + $0x11c] sm:$0xff] }
  0x7d   :  { %3200 = vst [vmem:[#allocation11_spill] sm:$0xff] %v2774_v7  ;;  %v2803_v24 = vrot.slane %v1725_v43, %v3196_v1  ;;  %v2806_v52 = vrot.slane %v1726_v53, %v3196_v1  ;;  %v2809_v11 = vrot.slane %v1727_v4, %v3196_v1  ;;  %v1218_v42 = vcombine.low %v2629_v31, %v2632_v40  ;;  %v44_v4 = vld [vmem:[#allocation3 + $0x18] sm:$0xff]  ;;  %v49_v7 = vld [vmem:[#allocation3 + $0x40] sm:$0xff] }
  0x7e   :  { %3201 = vst [vmem:[#allocation12_spill] sm:$0xff] %v2777_v44  ;;  %3203 = vst [vmem:[#allocation14_spill] sm:$0xff] %v2793_v48  ;;  %v1244_v55 = vrot.slane %v1222_v16, %v3196_v1  ;;  %v3209_v16 = vld [vmem:[#allocation40_spill] sm:$0xff]  ;;  %v1219_v43 = vcombine.high %v2629_v31, %v2632_v40  ;;  %v1842_v53 = vadd.f32 %v1217_v6, %v1216_v32 }
  0x7f   :  { %3204 = vst [vmem:[#allocation15_spill] sm:$0xff] %v2800_v29  ;;  %3205 = vst [vmem:[#allocation16_spill] sm:$0xff] %v2803_v24  ;;  %v527_v50 = vcombine.low %v3209_v16, %v3208_v33  ;;  %v528_v47 = vcombine.high %v3209_v16, %v3208_v33  ;;  %v529_v36 = vcombine.low %v3211_v3, %v3210_v13  ;;  %v95_v37 = vld [vmem:[#allocation3 + $0x19e] sm:$0xff] }
  0x80   :  { %3206 = vst [vmem:[#allocation17_spill] sm:$0xff] %v2806_v52  ;;  %3207 = vst [vmem:[#allocation18_spill] sm:$0xff] %v2809_v11  ;;  %v530_v0 = vcombine.high %v3211_v3, %v3210_v13  ;;  %v1237_v33 = vrot.slane %v1221_v26, %v3196_v1  ;;  %v1251_v31 = vrot.slane %v1223_v19, %v3196_v1  ;;  %v3212_v32 = vld [vmem:[#allocation44_spill] sm:$0xff]  ;;  %v3217_v19 = vld [vmem:[#allocation22_spill] sm:$0xff] }
  0x81   :  { %v1252_v40 = vcombine.low %v2653_v57, %v1244_v55  ;;  %v1256_v6 = vcombine.low %v3212_v32, %v2502_v58  ;;  %v1258_v13 = vcombine.low %v2542_v62, %v2582_v39  ;;  %v1843_v3 = vadd.f32 %v1842_v53, %v1218_v42  ;;  %v3213_v16 = vld [vmem:[#allocation20_spill] sm:$0xff] }
  0x82   :  { %v3215_v25 = vcombine.low %v3213_v16, %v3214_v9  ;;  %v3216_v60 = vcombine.high %v3213_v16, %v3214_v9  ;;  %v3219_v35 = vcombine.low %v3217_v19, %v3218_v5  ;;  %v3220_v30 = vcombine.high %v3217_v19, %v3218_v5 }
  0x83   :  { %v1051_v53 = vmul.f32 %v527_v50, %v44_v4  ;;  %v1068_v20 = vmul.f32 %v528_v47, %v61_v59  ;;  %v1253_v11 = vcombine.high %v2653_v57, %v1244_v55  ;;  %v1085_v24 = vmul.f32 %v529_v36, %v78_v41  ;;  %v3222_v50 = vld [vmem:[#allocation24_spill] sm:$0xff]  ;;  %v3223_v36 = vld [vmem:[#allocation27_spill] sm:$0xff] }
  0x84   :  { %v541_v26 = vrot.slane %v3215_v25, %v3196_v1  ;;  %v548_v18 = vrot.slane %v3216_v60, %v3196_v1  ;;  %v555_v61 = vrot.slane %v3219_v35, %v3196_v1  ;;  %v562_v42 = vrot.slane %v3220_v30, %v3196_v1  ;;  %v3221_v30 = vld [vmem:[#allocation25_spill] sm:$0xff]  ;;  %v45_v4 = vld [vmem:[#allocation3 + $0x20] sm:$0xff] }
  0x85   :  { %v1844_v25 = vadd.f32 %v1843_v3, %v1219_v43  ;;  %v1102_v52 = vmul.f32 %v530_v0, %v95_v37  ;;  %v1254_v29 = vcombine.low %v1237_v33, %v1251_v31  ;;  %v1257_v16 = vcombine.high %v3212_v32, %v2502_v58  ;;  %v3224_v0 = vld [vmem:[#allocation26_spill] sm:$0xff]  ;;  %v62_v41 = vld [vmem:[#allocation3 + $0xa2] sm:$0xff] }
  0x86   :  { %v1259_v9 = vcombine.high %v2542_v62, %v2582_v39  ;;  %v1266_v35 = vrot.slane %v1256_v6, %v3196_v1  ;;  %v1280_v60 = vrot.slane %v1258_v13, %v3196_v1  ;;  %v567_v59 = vcombine.low %v3222_v50, %v3221_v30  ;;  %v79_v13 = vld [vmem:[#allocation3 + $0x124] sm:$0xff] }
  0x87   :  { %v1845_v5 = vadd.f32 %v1844_v25, %v1252_v40  ;;  %v568_v57 = vcombine.high %v3222_v50, %v3221_v30  ;;  %v569_v55 = vcombine.low %v3224_v0, %v3223_v36  ;;  %v570_v58 = vcombine.high %v3224_v0, %v3223_v36  ;;  %v96_v3 = vld [vmem:[#allocation3 + $0x1a6] sm:$0xff] }
  0x88   :  { %v563_v47 = vcombine.low %v541_v26, %v555_v61  ;;  %v564_v43 = vcombine.high %v541_v26, %v555_v61  ;;  %v1255_v62 = vcombine.high %v1237_v33, %v1251_v31  ;;  %v565_v37 = vcombine.low %v548_v18, %v562_v42 }
  0x89   :  { %v1846_v39 = vadd.f32 %v1845_v5, %v1253_v11  ;;  %v566_v40 = vcombine.high %v548_v18, %v562_v42  ;;  %v1273_v32 = vrot.slane %v1257_v16, %v3196_v1  ;;  %v1292_v6 = vcombine.low %v1051_v53, %v1068_v20 }
  0x8a   :  { %v1287_v19 = vrot.slane %v1259_v9, %v3196_v1  ;;  %v1288_v25 = vcombine.low %v1266_v35, %v1280_v60  ;;  %v1294_v30 = vcombine.low %v1085_v24, %v1102_v52  ;;  %v577_v36 = vrot.slane %v567_v59, %v3196_v1 }
  0x8b   :  { %v1847_v50 = vadd.f32 %v1846_v39, %v1254_v29  ;;  %v584_v61 = vrot.slane %v568_v57, %v3196_v1  ;;  %v591_v11 = vrot.slane %v569_v55, %v3196_v1  ;;  %v598_v33 = vrot.slane %v570_v58, %v3196_v1  ;;  %v3225_v39 = vld [vmem:[#allocation29_spill] sm:$0xff]  ;;  %v3226_v57 = vld [vmem:[#allocation28_spill] sm:$0xff]  ;;  %v3227_v58 = vld [vmem:[#allocation31_spill] sm:$0xff] }
  0x8c   :  { %v1052_v31 = vmul.f32 %v563_v47, %v45_v4  ;;  %v1069_v26 = vmul.f32 %v564_v43, %v62_v41  ;;  %v1289_v18 = vcombine.high %v1266_v35, %v1280_v60  ;;  %v1086_v16 = vmul.f32 %v565_v37, %v79_v13  ;;  %v3228_v47 = vld [vmem:[#allocation30_spill] sm:$0xff]  ;;  %v46_v43 = vld [vmem:[#allocation3 + $0x28] sm:$0xff] }
  0x8d   :  { %v1848_v42 = vadd.f32 %v1847_v50, %v1255_v62  ;;  %v1103_v5 = vmul.f32 %v566_v40, %v96_v3  ;;  %v1293_v0 = vcombine.high %v1051_v53, %v1068_v20  ;;  %v1295_v48 = vcombine.high %v1085_v24, %v1102_v52  ;;  %v63_v62 = vld [vmem:[#allocation3 + $0xaa] sm:$0xff] }
  0x8e   :  { %v1290_v9 = vcombine.low %v1273_v32, %v1287_v19  ;;  %v1302_v44 = vrot.slane %v1292_v6, %v3196_v1  ;;  %v1316_v29 = vrot.slane %v1294_v30, %v3196_v1  ;;  %v603_v45 = vcombine.low %v3226_v57, %v3225_v39  ;;  %v80_v6 = vld [vmem:[#allocation3 + $0x12c] sm:$0xff] }
  0x8f   :  { %v1849_v59 = vadd.f32 %v1848_v42, %v1288_v25  ;;  %v604_v55 = vcombine.high %v3226_v57, %v3225_v39  ;;  %v605_v35 = vcombine.low %v3228_v47, %v3227_v58  ;;  %v606_v60 = vcombine.high %v3228_v47, %v3227_v58  ;;  %v97_v13 = vld [vmem:[#allocation3 + $0x1ae] sm:$0xff] }
  0x90   :  { %v599_v20 = vcombine.low %v577_v36, %v591_v11  ;;  %v600_v24 = vcombine.high %v577_v36, %v591_v11  ;;  %v1291_v52 = vcombine.high %v1273_v32, %v1287_v19  ;;  %v601_v4 = vcombine.low %v584_v61, %v598_v33  ;;  %v3229_v47 = vld [vmem:[#allocation33_spill] sm:$0xff] }
  0x91   :  { %v1850_v53 = vadd.f32 %v1849_v59, %v1289_v18  ;;  %v602_v41 = vcombine.high %v584_v61, %v598_v33  ;;  %v1309_v37 = vrot.slane %v1293_v0, %v3196_v1  ;;  %v1323_v40 = vrot.slane %v1295_v48, %v3196_v1 }
  0x92   :  { %v1324_v3 = vcombine.low %v1302_v44, %v1316_v29  ;;  %v1328_v25 = vcombine.low %v1052_v31, %v1069_v26  ;;  %v1330_v30 = vcombine.low %v1086_v16, %v1103_v5  ;;  %v613_v42 = vrot.slane %v603_v45, %v3196_v1 }
  0x93   :  { %v1851_v50 = vadd.f32 %v1850_v53, %v1290_v9  ;;  %v620_v36 = vrot.slane %v604_v55, %v3196_v1  ;;  %v627_v32 = vrot.slane %v605_v35, %v3196_v1  ;;  %v634_v19 = vrot.slane %v606_v60, %v3196_v1  ;;  %v3230_v55 = vld [vmem:[#allocation32_spill] sm:$0xff]  ;;  %v3231_v60 = vld [vmem:[#allocation35_spill] sm:$0xff] }
  0x94   :  { %v1053_v11 = vmul.f32 %v599_v20, %v46_v43  ;;  %v1070_v61 = vmul.f32 %v600_v24, %v63_v62  ;;  %v1325_v33 = vcombine.high %v1302_v44, %v1316_v29  ;;  %v1087_v0 = vmul.f32 %v601_v4, %v80_v6  ;;  %v3232_v20 = vld [vmem:[#allocation34_spill] sm:$0xff] }
  0x95   :  { %v1852_v18 = vadd.f32 %v1851_v50, %v1291_v52  ;;  %v1104_v48 = vmul.f32 %v602_v41, %v97_v13  ;;  %v1326_v59 = vcombine.low %v1309_v37, %v1323_v40  ;;  %v1329_v39 = vcombine.high %v1052_v31, %v1069_v26  ;;  %v64_v52 = vld [vmem:[#allocation3 + $0xb2] sm:$0xff] }
  0x96   :  { %v1331_v57 = vcombine.high %v1086_v16, %v1103_v5  ;;  %v1338_v58 = vrot.slane %v1328_v25, %v3196_v1  ;;  %v1352_v9 = vrot.slane %v1330_v30, %v3196_v1  ;;  %v639_v53 = vcombine.low %v3230_v55, %v3229_v47  ;;  %v47_v5 = vld [vmem:[#allocation3 + $0x30] sm:$0xff] }
  0x97   :  { %v1853_v45 = vadd.f32 %v1852_v18, %v1324_v3  ;;  %v640_v35 = vcombine.high %v3230_v55, %v3229_v47  ;;  %v641_v44 = vcombine.low %v3232_v20, %v3231_v60  ;;  %v642_v29 = vcombine.high %v3232_v20, %v3231_v60  ;;  %v81_v6 = vld [vmem:[#allocation3 + $0x134] sm:$0xff]  ;;  %v3233_v20 = vld [vmem:[#allocation37_spill] sm:$0xff] }
  0x98   :  { %v635_v24 = vcombine.low %v613_v42, %v627_v32  ;;  %v636_v31 = vcombine.high %v613_v42, %v627_v32  ;;  %v1327_v26 = vcombine.high %v1309_v37, %v1323_v40  ;;  %v637_v43 = vcombine.low %v620_v36, %v634_v19  ;;  %v98_v13 = vld [vmem:[#allocation3 + $0x1b6] sm:$0xff] }
  0x99   :  { %v1854_v16 = vadd.f32 %v1853_v45, %v1325_v33  ;;  %v638_v62 = vcombine.high %v620_v36, %v634_v19  ;;  %v1345_v4 = vrot.slane %v1329_v39, %v3196_v1  ;;  %v1364_v41 = vcombine.low %v1053_v11, %v1070_v61 }
  0x9a   :  { %v1359_v3 = vrot.slane %v1331_v57, %v3196_v1  ;;  %v1360_v25 = vcombine.low %v1338_v58, %v1352_v9  ;;  %v1366_v30 = vcombine.low %v1087_v0, %v1104_v48  ;;  %v649_v18 = vrot.slane %v639_v53, %v3196_v1 }
  0x9b   :  { %v1855_v50 = vadd.f32 %v1854_v16, %v1326_v59  ;;  %v656_v42 = vrot.slane %v640_v35, %v3196_v1  ;;  %v663_v37 = vrot.slane %v641_v44, %v3196_v1  ;;  %v670_v40 = vrot.slane %v642_v29, %v3196_v1  ;;  %v3234_v35 = vld [vmem:[#allocation36_spill] sm:$0xff]  ;;  %v3235_v29 = vld [vmem:[#allocation39_spill] sm:$0xff] }
  0x9c   :  { %v1054_v32 = vmul.f32 %v635_v24, %v47_v5  ;;  %v1071_v36 = vmul.f32 %v636_v31, %v64_v52  ;;  %v1361_v19 = vcombine.high %v1338_v58, %v1352_v9  ;;  %v1088_v39 = vmul.f32 %v637_v43, %v81_v6  ;;  %v3236_v24 = vld [vmem:[#allocation38_spill] sm:$0xff]  ;;  %v99_v6 = vld [vmem:[#allocation3 + $0x1be] sm:$0xff] }
  0x9d   :  { %v1856_v33 = vadd.f32 %v1855_v50, %v1327_v26  ;;  %v1105_v45 = vmul.f32 %v638_v62, %v98_v13  ;;  %v1365_v47 = vcombine.high %v1053_v11, %v1070_v61  ;;  %v1367_v55 = vcombine.high %v1087_v0, %v1104_v48  ;;  %v48_v31 = vld [vmem:[#allocation3 + $0x38] sm:$0xff] }
  0x9e   :  { %v1362_v57 = vcombine.low %v1345_v4, %v1359_v3  ;;  %v1374_v60 = vrot.slane %v1364_v41, %v3196_v1  ;;  %v1388_v59 = vrot.slane %v1366_v30, %v3196_v1  ;;  %v675_v16 = vcombine.low %v3234_v35, %v3233_v20  ;;  %v65_v26 = vld [vmem:[#allocation3 + $0xba] sm:$0xff] }
  0x9f   :  { %v1857_v53 = vadd.f32 %v1856_v33, %v1360_v25  ;;  %v676_v44 = vcombine.high %v3234_v35, %v3233_v20  ;;  %v677_v58 = vcombine.low %v3236_v24, %v3235_v29  ;;  %v678_v9 = vcombine.high %v3236_v24, %v3235_v29  ;;  %v82_v41 = vld [vmem:[#allocation3 + $0x13c] sm:$0xff] }
  0xa0   :  { %v671_v11 = vcombine.low %v649_v18, %v663_v37  ;;  %v672_v61 = vcombine.high %v649_v18, %v663_v37  ;;  %v1363_v0 = vcombine.high %v1345_v4, %v1359_v3  ;;  %v673_v5 = vcombine.low %v656_v42, %v670_v40 }
  0xa1   :  { %v1858_v48 = vadd.f32 %v1857_v53, %v1361_v19  ;;  %v674_v52 = vcombine.high %v656_v42, %v670_v40  ;;  %v1381_v43 = vrot.slane %v1365_v47, %v3196_v1  ;;  %v1395_v62 = vrot.slane %v1367_v55, %v3196_v1 }
  0xa2   :  { %v1396_v13 = vcombine.low %v1374_v60, %v1388_v59  ;;  %v1400_v25 = vcombine.low %v1054_v32, %v1071_v36  ;;  %v1402_v30 = vcombine.low %v1088_v39, %v1105_v45  ;;  %v685_v33 = vrot.slane %v675_v16, %v3196_v1 }
  0xa3   :  { %v1859_v50 = vadd.f32 %v1858_v48, %v1362_v57  ;;  %v692_v18 = vrot.slane %v676_v44, %v3196_v1  ;;  %v699_v4 = vrot.slane %v677_v58, %v3196_v1  ;;  %v706_v3 = vrot.slane %v678_v9, %v3196_v1  ;;  %v66_v9 = vld [vmem:[#allocation3 + $0xc2] sm:$0xff] }
  0xa4   :  { %v1055_v37 = vmul.f32 %v671_v11, %v48_v31  ;;  %v1072_v42 = vmul.f32 %v672_v61, %v65_v26  ;;  %v1397_v40 = vcombine.high %v1374_v60, %v1388_v59  ;;  %v1089_v47 = vmul.f32 %v673_v5, %v82_v41  ;;  %v100_v31 = vld [vmem:[#allocation3 + $0x1c6] sm:$0xff] }
  0xa5   :  { %v1860_v19 = vadd.f32 %v1859_v50, %v1363_v0  ;;  %v1106_v55 = vmul.f32 %v674_v52, %v99_v6  ;;  %v1398_v53 = vcombine.low %v1381_v43, %v1395_v62  ;;  %v1401_v20 = vcombine.high %v1054_v32, %v1071_v36  ;;  %v83_v0 = vld [vmem:[#allocation3 + $0x144] sm:$0xff] }
  0xa6   :  { %v1403_v35 = vcombine.high %v1088_v39, %v1105_v45  ;;  %v1410_v29 = vrot.slane %v1400_v25, %v3196_v1  ;;  %v1424_v57 = vrot.slane %v1402_v30, %v3196_v1  ;;  %v707_v24 = vcombine.low %v685_v33, %v699_v4 }
  0xa7   :  { %v1861_v16 = vadd.f32 %v1860_v19, %v1396_v13  ;;  %v708_v44 = vcombine.high %v685_v33, %v699_v4  ;;  %v1399_v48 = vcombine.high %v1381_v43, %v1395_v62  ;;  %v709_v11 = vcombine.low %v692_v18, %v706_v3 }
  0xa8   :  { %v710_v61 = vcombine.high %v692_v18, %v706_v3  ;;  %v1417_v60 = vrot.slane %v1401_v20, %v3196_v1  ;;  %v1436_v59 = vcombine.low %v1055_v37, %v1072_v42  ;;  %v1431_v32 = vrot.slane %v1403_v35, %v3196_v1 }
  0xa9   :  { %v1862_v58 = vadd.f32 %v1861_v16, %v1397_v40  ;;  %v1432_v36 = vcombine.low %v1410_v29, %v1424_v57  ;;  %v1438_v39 = vcombine.low %v1089_v47, %v1106_v55  ;;  %v1056_v26 = vmul.f32 %v707_v24, %v49_v7 }
  0xaa   :  { %v1073_v5 = vmul.f32 %v708_v44, %v66_v9  ;;  %v1433_v52 = vcombine.high %v1410_v29, %v1424_v57  ;;  %v1090_v43 = vmul.f32 %v709_v11, %v83_v0  ;;  %v1107_v62 = vmul.f32 %v710_v61, %v100_v31 }
  0xab   :  { %v1863_v45 = vadd.f32 %v1862_v58, %v1398_v53  ;;  %v1437_v6 = vcombine.high %v1055_v37, %v1072_v42  ;;  %v1439_v13 = vcombine.high %v1089_v47, %v1106_v55  ;;  %v1434_v25 = vcombine.low %v1417_v60, %v1431_v32 }
  0xac   :  { %v1446_v30 = vrot.slane %v1436_v59, %v3196_v1  ;;  %v1460_v50 = vrot.slane %v1438_v39, %v3196_v1  ;;  %v1435_v18 = vcombine.high %v1417_v60, %v1431_v32  ;;  %v1472_v19 = vcombine.low %v1056_v26, %v1073_v5 }
  0xad   :  { %v1864_v41 = vadd.f32 %v1863_v45, %v1399_v48  ;;  %v1453_v3 = vrot.slane %v1437_v6, %v3196_v1  ;;  %v1467_v40 = vrot.slane %v1439_v13, %v3196_v1  ;;  %v1474_v53 = vcombine.low %v1090_v43, %v1107_v62 }
  0xae   :  { %v1468_v7 = vcombine.low %v1446_v30, %v1460_v50  ;;  %v1469_v35 = vcombine.high %v1446_v30, %v1460_v50  ;;  %v1473_v42 = vcombine.high %v1056_v26, %v1073_v5  ;;  %v1475_v47 = vcombine.high %v1090_v43, %v1107_v62 }
  0xaf   :  { %v1865_v33 = vadd.f32 %v1864_v41, %v1432_v36  ;;  %v1470_v37 = vcombine.low %v1453_v3, %v1467_v40  ;;  %v1482_v55 = vrot.slane %v1472_v19, %v3196_v1  ;;  %v1496_v57 = vrot.slane %v1474_v53, %v3196_v1 }
  0xb0   :  { %v1471_v24 = vcombine.high %v1453_v3, %v1467_v40  ;;  %v1489_v48 = vrot.slane %v1473_v42, %v3196_v1  ;;  %v1503_v58 = vrot.slane %v1475_v47, %v3196_v1  ;;  %v3237_v45 = vcombine.low %v2639_v22, %v2645_v15  ;;  %v1956_v40 = vld [vmem:[#allocation5 + $0x40] ss:$0 sm:$0xff] }
  0xb1   :  { %v1866_v4 = vadd.f32 %v1865_v33, %v1433_v52  ;;  %v1504_v9 = vcombine.low %v1482_v55, %v1496_v57  ;;  %v1505_v61 = vcombine.high %v1482_v55, %v1496_v57  ;;  %v3238_v5 = vcombine.high %v2639_v22, %v2645_v15  ;;  %v57_v55 = vld [vmem:[#allocation3 + $0x80] sm:$0x3] }
  0xb2   :  { %v1506_v59 = vcombine.low %v1489_v48, %v1503_v58  ;;  %v1507_v31 = vcombine.high %v1489_v48, %v1503_v58  ;;  %v3239_v41 = vcombine.low %v2642_v8, %v2648_v23  ;;  %v3240_v62 = vcombine.high %v2642_v8, %v2648_v23 }
  0xb3   :  { %v1867_v20 = vadd.f32 %v1866_v4, %v1434_v25  ;;  %v3241_v13 = vcombine.low %v2666_v38, %v2672_v63  ;;  %v3242_v30 = vcombine.high %v2666_v38, %v2672_v63  ;;  %v3243_v22 = vcombine.low %v2669_v54, %v2679_v51 }
  0xb4   :  { %v3244_v33 = vcombine.high %v2669_v54, %v2679_v51  ;;  %v3245_v8 = vcombine.low %v2688_v17, %v2694_v21  ;;  %v3246_v4 = vcombine.high %v2688_v17, %v2694_v21  ;;  %v3247_v38 = vcombine.low %v2691_v14, %v2697_v10 }
  0xb5   :  { %v1868_v29 = vadd.f32 %v1867_v20, %v1435_v18  ;;  %v3249_v54 = vcombine.low %v2718_v46, %v2724_v56  ;;  %v963_v53 = vcombine.high %v1956_v40, %v1956_v40  ;;  %v3250_v20 = vcombine.high %v2718_v46, %v2724_v56  ;;  %v74_v56 = vld [vmem:[#allocation3 + $0x102] sm:$0x3] }
  0xb6   :  { %v3251_v17 = vcombine.low %v2721_v34, %v2735_v28  ;;  %v3253_v42 = vcombine.low %v2744_v2, %v2750_v12  ;;  %v3255_v58 = vcombine.low %v2747_v27, %v2753_v49 }
  0xb7   :  { %v1869_v16 = vadd.f32 %v1868_v29, %v1468_v7  ;;  %v3248_v7 = vcombine.high %v2691_v14, %v2697_v10  ;;  %v970_v29 = vrot.slane %v1956_v40, %v3196_v1  ;;  %v3252_v14 = vcombine.high %v2721_v34, %v2735_v28 }
  0xb9   :  { %v1870_v44 = vadd.f32 %v1869_v16, %v1469_v35  ;;  %v978_v57 = vcombine.high %v970_v29, %v970_v29  ;;  %v91_v16 = vld [vmem:[#allocation3 + $0x184] sm:$0x3]  ;;  %v1064_v34 = vmul.f32 %v970_v29, %v57_v55 }
  0xbb   :  { %v1871_v11 = vadd.f32 %v1870_v44, %v1470_v37  ;;  %v977_v37 = vrot.slane %v963_v53, %v3196_v1  ;;  %v3254_v44 = vcombine.high %v2744_v2, %v2750_v12  ;;  %v1081_v28 = vmul.f32 %v978_v57, %v74_v56 }
  0xbd   :  { %v1872_v60 = vadd.f32 %v1871_v11, %v1471_v24  ;;  %v979_v46 = vcombine.high %v977_v37, %v977_v37  ;;  %v108_v24 = vld [vmem:[#allocation3 + $0x206] sm:$0x3]  ;;  %v1098_v11 = vmul.f32 %v977_v37, %v91_v16 }
  0xbf   :  { %v1873_v0 = vadd.f32 %v1872_v60, %v1504_v9  ;;  %v3256_v60 = vcombine.high %v2747_v27, %v2753_v49 }
  0xc1   :  { %v1874_v32 = vadd.f32 %v1873_v0, %v1505_v61  ;;  %v1115_v61 = vmul.f32 %v979_v46, %v108_v24  ;;  %v3257_v0 = vld [vmem:[#allocation11_spill] sm:$0xff] }
  0xc3   :  { %v1875_v36 = vadd.f32 %v1874_v32, %v1506_v59 }
  0xc5   :  { %v1876_v39 = vadd.f32 %v1875_v36, %v1507_v31  ;;  %v3258_v31 = vld [vmem:[#allocation13_spill] sm:$0xff] }
  0xc6   :  { %v3259_v32 = vcombine.low %v3257_v0, %v3258_v31  ;;  %v3260_v2 = vcombine.high %v3257_v0, %v3258_v31 }
  0xc7   :  { %v1877_v26 = vadd.f32 %v1876_v39, %v3237_v45  ;;  %v1760_v39 = vcombine.low %v1064_v34, %v1081_v28  ;;  %v1761_v45 = vcombine.low %v1098_v11, %v1115_v61 }
  0xc9   :  { %v1878_v52 = vadd.f32 %v1877_v26, %v3238_v5  ;;  %v3261_v26 = vld [vmem:[#allocation12_spill] sm:$0xff]  ;;  %v3262_v5 = vld [vmem:[#allocation14_spill] sm:$0xff] }
  0xca   :  { %v3264_v27 = vcombine.high %v3261_v26, %v3262_v5 }
  0xcb   :  { %v1879_v43 = vadd.f32 %v1878_v52, %v3239_v41  ;;  %v3263_v52 = vcombine.low %v3261_v26, %v3262_v5 }
  0xcd   :  { %v1880_v6 = vadd.f32 %v1879_v43, %v3240_v62  ;;  %v1768_v43 = vrot.slane %v1760_v39, %v3196_v1  ;;  %v1775_v62 = vrot.slane %v1761_v45, %v3196_v1 }
  0xcf   :  { %v1881_v25 = vadd.f32 %v1880_v6, %v3241_v13  ;;  %v3265_v6 = vld [vmem:[#allocation15_spill] sm:$0xff]  ;;  %v3266_v13 = vld [vmem:[#allocation17_spill] sm:$0xff] }
  0xd1   :  { %v1882_v50 = vadd.f32 %v1881_v25, %v3242_v30  ;;  %v3267_v25 = vcombine.low %v3265_v6, %v3266_v13 }
  0xd3   :  { %v1883_v15 = vadd.f32 %v1882_v50, %v3243_v22  ;;  %v1776_v50 = vcombine.low %v1768_v43, %v1775_v62  ;;  %v3268_v22 = vcombine.high %v3265_v6, %v3266_v13 }
  0xd5   :  { %v1884_v18 = vadd.f32 %v1883_v15, %v3244_v33  ;;  %v3269_v33 = vld [vmem:[#allocation16_spill] sm:$0xff] }
  0xd7   :  { %v1885_v23 = vadd.f32 %v1884_v18, %v3245_v8  ;;  %v3270_v18 = vld [vmem:[#allocation18_spill] sm:$0xff] }
  0xd8   :  { %v3271_v8 = vcombine.low %v3269_v33, %v3270_v18  ;;  %v3272_v1 = vcombine.high %v3269_v33, %v3270_v18 }
  0xd9   :  { %v1886_v3 = vadd.f32 %v1885_v23, %v3246_v4  ;;  %v1906_v4 = vsel %vm1905_vm0, %v1776_v50, 0.0 }
  0xdb   :  { %v1887_v63 = vadd.f32 %v1886_v3, %v3247_v38 }
  0xdd   :  { %v1888_v19 = vadd.f32 %v1887_v63, %v3248_v7  ;;  %v1911_v63 = vstv %s3048_s2 }
  0xdf   :  { %v1889_v51 = vadd.f32 %v1888_v19, %v3249_v54 }
  0xe1   :  { %v1890_v35 = vadd.f32 %v1889_v51, %v3250_v20 }
  0xe3   :  { %v1891_v21 = vadd.f32 %v1890_v35, %v3251_v17 }
  0xe5   :  { %v1892_v10 = vadd.f32 %v1891_v21, %v3252_v14 }
  0xe7   :  { %v1893_v47 = vadd.f32 %v1892_v10, %v3253_v42 }
  0xe9   :  { %v1894_v48 = vadd.f32 %v1893_v47, %v3254_v44 }
  0xeb   :  { %v1895_v9 = vadd.f32 %v1894_v48, %v3255_v58 }
  0xed   :  { %v1896_v59 = vadd.f32 %v1895_v9, %v3256_v60 }
  0xef   :  { %v1897_v36 = vadd.f32 %v1896_v59, %v3259_v32 }
  0xf1   :  { %v1898_v12 = vadd.f32 %v1897_v36, %v3260_v2 }
  0xf3   :  { %v1899_v41 = vadd.f32 %v1898_v12, %v3263_v52 }
  0xf5   :  { %v1900_v49 = vadd.f32 %v1899_v41, %v3264_v27 }
  0xf7   :  { %v1901_v30 = vadd.f32 %v1900_v49, %v3267_v25 }
  0xf9   :  { %v1902_v15 = vadd.f32 %v1901_v30, %v3268_v22 }
  0xfb   :  { %v1903_v23 = vadd.f32 %v1902_v15, %v3271_v8 }
  0xfd   :  { %v1904_v3 = vadd.f32 %v1903_v23, %v3272_v1 }
  0xff   :  { %v1907_v38 = vadd.f32 %v1906_v4, %v1904_v3 }
 0x101   :  { %1908 = vadd.xlane.f32.xlu0 %v1907_v38 }
 0x18e   :  { %v1909_v40 = vpop.xlane.xlu0 %1908 }
 0x18f   :  { %v1912_v7 = vadd.f32 %v1911_v63, %v1909_v40 }
 0x191   :  { %1914 = vst.msk [vmem:[#allocation7] sm:$0xff] %vm1913_vm1, %v1912_v7 }
 0x198   :  { %v1932_v19 = vld [vmem:[#allocation7] sm:$0x3] }
 0x199   :  { %1933 = vst [vmem:[%s3049_s3] sm:$0x3] %v1932_v19 }
 0x19a   :  { %1950 = vsyncpa [#allocation4], 1 }
 0x19b   :  { %1951 = vsyncpa [#allocation6], 1 }

</bundles_post_ra>
